<compile_context>
chip_gen: v7x
topology: tpu7x:2x2x1
jax: 0.10.0
libtpu: 0.0.40
codegen_flags: <defaults>
</compile_context>

<pallas_src>
import functools

import jax
import jax.numpy as jnp
from jax.experimental import pallas as pl
from jax.experimental.pallas import tpu as pltpu


def _round_up(x: int, m: int) -> int:
    return ((x + m - 1) // m) * m


def _residual_layer_kernel(x_ref, w_ref, b_ref, o_ref, *, n_out, matmul_dtype):
    """One batch tile: o[:, :n_out] = relu(x @ W + b); o[:, n_out:] = x."""
    x = x_ref[...]
    # MXU matmul with f32 accumulation; bias/ReLU in f32.
    h = jnp.dot(
        x.astype(matmul_dtype),
        w_ref[...],
        preferred_element_type=jnp.float32,
    )
    h = jnp.maximum(h + b_ref[...], 0.0)  # bias + ReLU (module default nonlin)
    # batch_norm=False -> nn.Identity(); dropout=0.0 -> nn.Identity(): nothing to do.

    # Lane-dense store of the activation half at lane offset 0.
    o_ref[:, :n_out] = h.astype(o_ref.dtype)
    # Residual pass-through: exact copy of the (uncast) input tile at lane offset
    # n_out.  Masked vst only if n_in is not a multiple of 128.
    o_ref[:, n_out:] = x.astype(o_ref.dtype)


def _tpu_vmem_budget_and_num_tc():
    """Generation-aware VMEM budget (bytes) and TensorCores-per-chip estimate."""
    vmem_cap = None
    try:
        info = pltpu.get_tpu_info()
        vmem_cap = int(getattr(info, "vmem_capacity_bytes"))
    except Exception:
        vmem_cap = None

    kind = ""
    try:
        kind = jax.devices()[0].device_kind.lower()
    except Exception:
        pass

    if vmem_cap is None:
        # Conservative fallback: 64 MiB (v7x per-TC floor) unless clearly v5e/v6e.
        if ("v5" in kind) or ("v6" in kind):
            vmem_cap = 128 * 1024 * 1024
        else:
            vmem_cap = 64 * 1024 * 1024

    # v7x: 64 MiB per TC, 2 TCs per chip. v5e/v6e: 128 MiB, 1 TC.
    num_tc = 2 if ("v7" in kind or vmem_cap <= 64 * 1024 * 1024) else 1
    # Leave ~15% headroom for Mosaic internal scratch / metadata.
    budget = int(vmem_cap * 0.85)
    return budget, num_tc


def residual_layer(x, w, b, *, block_batch=1024, matmul_dtype=None):
    """Pallas TPU forward of ResidualLayer.

    Args:
      x: (B, n_in) input.
      w: (n_in, n_out) linear weight (pre-transposed from torch's (n_out, n_in)).
      b: (n_out,) linear bias.
      block_batch: target rows per grid step (upper bound; actual tile is sized
        from the generation-aware VMEM budget and rounded to 256-row granularity).
      matmul_dtype: dtype fed to the MXU (e.g. jnp.bfloat16). Defaults to x.dtype.
        Accumulation / bias / ReLU are always f32; the residual half is always
        written from the untouched input, so it is exact regardless.

    Returns:
      (B, n_out + n_in) = concat([relu(x @ w + b), x], axis=1).
    """
    B, n_in = x.shape
    n_in_w, n_out = w.shape
    assert n_in_w == n_in, (w.shape, x.shape)
    if matmul_dtype is None:
        matmul_dtype = x.dtype

    # Cast the resident weight once wrapper-side (halves its DMA bytes in bf16).
    # Do NOT cast x here: the residual half of the output must be exact.
    w = w.astype(matmul_dtype)
    b2d = b.reshape(1, n_out).astype(jnp.float32)

    # ---- Batch tile selection ---------------------------------------------------
    vmem_budget, num_tc = _tpu_vmem_budget_and_num_tc()

    x_item = x.dtype.itemsize
    o_item = x.dtype.itemsize
    w_bytes = w.size * w.dtype.itemsize
    b_bytes = b2d.size * b2d.dtype.itemsize

    # Resident operands (constant index_map) are counted ONCE; the streamed x and
    # out tiles are double-buffered by the BlockSpec pipeline.
    headroom = 2 * 1024 * 1024
    per_row_bytes = 2 * (n_in * x_item + (n_out + n_in) * o_item)
    avail = vmem_budget - w_bytes - b_bytes - headroom
    if avail < per_row_bytes * 8:
        # See TODO(synk) above: W too large for the resident strategy on this chip.
        avail = per_row_bytes * 8
    max_rows_budget = max(8, avail // per_row_bytes)

    gran = 256  # MXU-friendly granularity (v6e/v7x 2x256^2; also fine on v5e).
    tb = min(B, int(block_batch), int(max_rows_budget))

    if num_tc >= 2 and B >= 16:
        # Keep >= 2 grid steps so the "parallel" axis can shard across both TCs.
        half = -(-B // 2)
        half = _round_up(half, gran) if half >= gran else _round_up(half, 8)
        tb = min(tb, half)

    if tb < B:
        if tb >= gran:
            tb = (tb // gran) * gran
        else:
            tb = max(8, (tb // 8) * 8)
    tb = max(1, min(tb, B))

    grid = (pl.cdiv(B, tb),)

    # VMEM limit: resident W/b + double-buffered tiles + headroom, capped at budget.
    vmem_limit = int(
        min(vmem_budget,
            max(w_bytes + b_bytes + tb * per_row_bytes + headroom, 32 * 1024 * 1024))
    )

    cost = pl.CostEstimate(
        flops=2 * B * n_in * n_out,
        transcendentals=0,
        bytes_accessed=(B * n_in * x_item                 # x read
                        + B * (n_in + n_out) * o_item     # out write
                        + w_bytes + b_bytes),              # resident operands
    )

    kernel = functools.partial(
        _residual_layer_kernel, n_out=n_out, matmul_dtype=matmul_dtype
    )
    return pl.pallas_call(
        kernel,
        out_shape=jax.ShapeDtypeStruct((B, n_out + n_in), x.dtype),
        grid=grid,
        in_specs=[
            # x: streamed per batch tile (double-buffered by the pipeline).
            pl.BlockSpec((tb, n_in), lambda i: (i, 0)),
            # W, b: constant index_map -> fetched once, resident across the grid.
            pl.BlockSpec((n_in, n_out), lambda i: (0, 0)),
            pl.BlockSpec((1, n_out), lambda i: (0, 0)),
        ],
        # Full-width output rows per batch tile (single lane-dense slab).
        out_specs=pl.BlockSpec((tb, n_out + n_in), lambda i: (i, 0)),
        compiler_params=pltpu.CompilerParams(
            # Independent batch tiles -> megacore-shardable (up to 2x on v7x).
            dimension_semantics=("parallel",),
            vmem_limit_bytes=vmem_limit,
        ),
        cost_estimate=cost,
    )(x, w, b2d)


if __name__ == "__main__":
    key = jax.random.PRNGKey(0)
    kx, kw, kb = jax.random.split(key, 3)

    batch = 512
    n_units_in = 64
    n_units_out = 128  # multiple of 128 -> activation store lane-aligned

    # nn.Linear-style init: U(-1/sqrt(fan_in), 1/sqrt(fan_in)).
    bound = 1.0 / (n_units_in ** 0.5)
    w = jax.random.uniform(
        kw, (n_units_in, n_units_out), jnp.float32, minval=-bound, maxval=bound
    )
    b = jax.random.uniform(
        kb, (n_units_out,), jnp.float32, minval=-bound, maxval=bound
    )
    x = jax.random.normal(kx, (batch, n_units_in), jnp.float32)

    fn = jax.jit(residual_layer)
    out = jax.block_until_ready(fn(x, w, b))

    # Reference (same semantics as the PyTorch forward: cat([relu(linear(x)), x])).
    ref_h = jnp.maximum(jnp.dot(x, w, preferred_element_type=jnp.float32) + b, 0.0)
    assert out.shape == (batch, n_units_out + n_units_in)
    assert jnp.allclose(out[:, :n_units_out], ref_h, atol=1e-4, rtol=1e-4)
    # The residual half must be an exact pass-through of the input.
    assert jnp.array_equal(out[:, n_units_out:], x)

    # Optional bf16 MXU path (f32 accumulation): looser tolerance on the matmul
    # half, residual half still exact.  (Not a perf lever at these shapes -- the
    # kernel is HBM-bound -- but verifies the mixed-precision path.)
    out_bf16 = jax.block_until_ready(
        residual_layer(x, w, b, matmul_dtype=jnp.bfloat16)
    )
    assert jnp.allclose(out_bf16[:, :n_units_out], ref_h, atol=5e-2, rtol=5e-2)
    assert jnp.array_equal(out_bf16[:, n_units_out:], x)

    print("KERNEL_OK")
</pallas_src>

<mosaic_0001>
module attributes {stable_mosaic.version = 11 : i64} {
  func.func @_residual_layer_kernel(%arg0: i32, %arg1: memref<256x64xf32, #tpu.memory_space<vmem>>, %arg2: memref<64x128xf32, #tpu.memory_space<vmem>>, %arg3: memref<1x128xf32, #tpu.memory_space<vmem>>, %arg4: memref<256x192xf32, #tpu.memory_space<vmem>>) attributes {dimension_semantics = [#tpu.dimension_semantics<parallel>], iteration_bounds = array<i64: 2>, scalar_prefetch = 0 : i64, scratch_operands = 0 : i64, tpu.core_type = #tpu.core_type<tc>, window_params = [{transform_indices = @transform_0, window_bounds = array<i64: 256, 64>}, {pipeline_mode = #tpu.pipeline_mode<synchronous>, transform_indices = @transform_1, window_bounds = array<i64: 64, 128>}, {pipeline_mode = #tpu.pipeline_mode<synchronous>, transform_indices = @transform_2, window_bounds = array<i64: 1, 128>}, {transform_indices = @transform_3, window_bounds = array<i64: 256, 192>}]} {
    %c0 = arith.constant 0 : index
    %c0_0 = arith.constant 0 : index
    %0 = vector.load %arg1[%c0, %c0_0] : memref<256x64xf32, #tpu.memory_space<vmem>>, vector<256x64xf32>
    %c0_1 = arith.constant 0 : index
    %c0_2 = arith.constant 0 : index
    %1 = vector.load %arg2[%c0_1, %c0_2] : memref<64x128xf32, #tpu.memory_space<vmem>>, vector<64x128xf32>
    %cst = arith.constant dense<0.000000e+00> : vector<256x128xf32>
    %2 = tpu.matmul %0, %1, %cst {dimension_numbers = #tpu.dot_dimension_numbers<[1], [0], [0], [1], [0, 0, 1, 1], [], []>} : vector<256x64xf32>, vector<64x128xf32>, vector<256x128xf32> -> vector<256x128xf32>
    %c0_3 = arith.constant 0 : index
    %c0_4 = arith.constant 0 : index
    %3 = vector.load %arg3[%c0_3, %c0_4] : memref<1x128xf32, #tpu.memory_space<vmem>>, vector<1x128xf32>
    %4 = vector.broadcast %3 : vector<1x128xf32> to vector<256x128xf32>
    %5 = arith.addf %2, %4 : vector<256x128xf32>
    %cst_5 = arith.constant 0.000000e+00 : f32
    %6 = vector.broadcast %cst_5 : f32 to vector<256x128xf32>
    %7 = arith.maximumf %5, %6 : vector<256x128xf32>
    %c0_6 = arith.constant 0 : index
    %c0_7 = arith.constant 0 : index
    %8 = vector.load %arg4[%c0_6, %c0_7] : memref<256x192xf32, #tpu.memory_space<vmem>>, vector<256x128xf32>
    tpu.vector_store %arg4[%c0_6, %c0_7], %7 {strides = array<i32>} : memref<256x192xf32, #tpu.memory_space<vmem>>, vector<256x128xf32>,
    %c0_8 = arith.constant 0 : index
    %c128 = arith.constant 128 : index
    %9 = vector.load %arg4[%c0_8, %c128] : memref<256x192xf32, #tpu.memory_space<vmem>>, vector<256x64xf32>
    tpu.vector_store %arg4[%c0_8, %c128], %0 {strides = array<i32>} : memref<256x192xf32, #tpu.memory_space<vmem>>, vector<256x64xf32>,
    return
  }
  func.func @transform_0(%arg0: i32) -> (i32, i32) {
    %c0_i32 = arith.constant 0 : i32
    %c0_i32_0 = arith.constant 0 : i32
    return %arg0, %c0_i32 : i32, i32
  }
  func.func @transform_1(%arg0: i32) -> (i32, i32) {
    %c0_i32 = arith.constant 0 : i32
    %c0_i32_0 = arith.constant 0 : i32
    %c0_i32_1 = arith.constant 0 : i32
    return %c0_i32, %c0_i32_0 : i32, i32
  }
  func.func @transform_2(%arg0: i32) -> (i32, i32) {
    %c0_i32 = arith.constant 0 : i32
    %c0_i32_0 = arith.constant 0 : i32
    %c0_i32_1 = arith.constant 0 : i32
    return %c0_i32, %c0_i32_0 : i32, i32
  }
  func.func @transform_3(%arg0: i32) -> (i32, i32) {
    %c0_i32 = arith.constant 0 : i32
    %c0_i32_0 = arith.constant 0 : i32
    return %arg0, %c0_i32 : i32, i32
  }
}

</mosaic_0001>

<bundles_post_ra>
// kernel: residual_layer.1
= control target key start
LH: loop header
LB: loop body
LE: loop exit
PB: predicated region body
PF: predicated region fallthrough
CT: control target
= control target key end

     0   :  { %s909_s12 = smov 0   ;;  %s1179_s0 = inlined_call_operand.vmem [shape: f32[512,64], index: 0, kind: input, shape index: {}]   ;;  %s1180_s1 = inlined_call_operand.vmem [shape: f32[64,128], index: 1, kind: input, shape index: {}]   ;;  %s1181_s2 = inlined_call_operand.vmem [shape: f32[1,128], index: 2, kind: input, shape index: {}]   ;;  %s1182_s3 = inlined_call_operand.vmem [shape: f32[512,192], index: 3, kind: output, shape index: {}]  }
   0x1 LB: > { %s699_s13 = sadd.s32 4294967295, %s887_s12   ;;  %p703_p0 = scmp.ge.s32.totalorder %s887_s12, 1  ;;  %s887_s12 = sphi %s909_s12, %s13_s12  }
   0x2   : > { %p138_p1 = scmp.lt.s32.totalorder %s887_s12, 3 }
   0x4   : > { %p139_p2 = pnand %p703_p0, %p138_p1 }
   0x5   : > { %v208_v0 = vld [vmem:[%s1180_s1] sm:$0xff] (!%p139_p2)  ;;  %v209_v1 = vld [vmem:[%s1180_s1 + $0x8] sm:$0xff] (!%p139_p2)  ;;  %v210_v2 = vld [vmem:[%s1180_s1 + $0x10] sm:$0xff] (!%p139_p2)  ;;  %s704_s20 = sshll.u32 (!%p139_p2), %s699_s13, 5  ;;  %vm223_vm0 = vcmask (!%p139_p2), 523264  }
   0x6   : > { %142 = sbr.rel (%p139_p2) target bundleno = 271 (0x10f), region = 32  ;;  %v849_v3 = vpack.c.bf16 (!%p139_p2), %v209_v1, %v208_v0  ;;  %v211_v4 = vld [vmem:[%s1180_s1 + $0x18] sm:$0xff] (!%p139_p2)  ;;  %p164_p3 = scmp.lt.s32.totalorder (!%p139_p2), %s704_s20, 63  ;;  %v212_v6 = vld [vmem:[%s1180_s1 + $0x20] sm:$0xff] (!%p139_p2)  ;;  %v213_v7 = vld [vmem:[%s1180_s1 + $0x28] sm:$0xff] (!%p139_p2) }
   0x7   : > { %v853_v5 = vpack.c.bf16 (!%p139_p2), %v211_v4, %v210_v2  ;;  %v857_v8 = vpack.c.bf16 (!%p139_p2), %v213_v7, %v212_v6  ;;  %v214_v9 = vld [vmem:[%s1180_s1 + $0x30] sm:$0xff] (!%p139_p2)  ;;  %v215_v10 = vld [vmem:[%s1180_s1 + $0x38] sm:$0xff] (!%p139_p2)  ;;  %v1110_v44 = vld [vmem:[%s1181_s2] ss:$0 sm:$0xff] (!%p139_p2) }
   0x8   : > { %850 = vmatprep.subr.bf16.mxu0 (!%p139_p2), %v849_v3  ;;  %865 = vmatprep.subr.bf16.mxu1 (!%p139_p2), %v849_v3  ;;  %v861_v17 = vpack.c.bf16 (!%p139_p2), %v215_v10, %v214_v9 }
   0x9   : > { %852 = vmatpush3.bf16.msra.mxu0 (!%p139_p2), %v849_v3  ;;  %869 = vmatpush3.bf16.msra.mxu1 (!%p139_p2), %v849_v3 }
   0xa   : > { %854 = vmatprep.subr.bf16.mxu0 (!%p139_p2), %v853_v5  ;;  %866 = vmatprep.subr.bf16.mxu1 (!%p139_p2), %v853_v5 }
   0xd   : > { %s1184_s20 = smov (!%p164_p3, %s704_s20), 63  ;;  %856 = vmatpush3.bf16.msra.mxu0 %v853_v5  ;;  %870 = vmatpush3.bf16.msra.mxu1 %v853_v5 }
   0xe   : > { %s705_s27 = sshll.u32 %s1184_s20, 3  ;;  %s744_s28 = sshll.u32 %s1184_s20, 4  ;;  %858 = vmatprep.subr.bf16.mxu0 %v857_v8  ;;  %867 = vmatprep.subr.bf16.mxu1 %v857_v8 }
   0xf   : > { %s944_s8 = scalar_lea.vmem %s1179_s0, %s705_s27  ;;  %s949_s11 = scalar_lea.vmem %s1182_s3, %s744_s28 }
  0x10   : > { %v176_v11 = vld [vmem:[%s944_s8] sm:$0xff]  ;;  %v954_v13 = vld [vmem:[%s944_s8 + $0x8] sm:$0xff]  ;;  %v967_v15 = vld [vmem:[%s944_s8 + $0x10] sm:$0xff] }
  0x11   : > { %v192_v12 = vld [vmem:[%s944_s8 + $0x80] sm:$0xff]  ;;  %609 = vst.msk [vmem:[%s949_s11 + $0x8] sm:$0xff] %vm223_vm0, %v176_v11  ;;  %610 = vst.msk [vmem:[%s949_s11 + $0x18] sm:$0xff] %vm223_vm0, %v954_v13  ;;  %v964_v14 = vld [vmem:[%s944_s8 + $0x88] sm:$0xff]  ;;  %801 = vmatprep.mubr.msk.f32.mxu0 %vm223_vm0, %v176_v11  ;;  %860 = vmatpush3.bf16.msra.mxu0 %v857_v8 }
  0x12   : > { %625 = vst.msk [vmem:[%s949_s11 + $0x108] sm:$0xff] %vm223_vm0, %v192_v12  ;;  %v970_v16 = vld [vmem:[%s944_s8 + $0x90] sm:$0xff]  ;;  %626 = vst.msk [vmem:[%s949_s11 + $0x118] sm:$0xff] %vm223_vm0, %v964_v14  ;;  %v982_v18 = vld [vmem:[%s944_s8 + $0x18] sm:$0xff]  ;;  %825 = vmatprep.mubr.msk.f32.mxu1 %vm223_vm0, %v192_v12  ;;  %871 = vmatpush3.bf16.msra.mxu1 %v857_v8 }
  0x13   : > { %611 = vst.msk [vmem:[%s949_s11 + $0x28] sm:$0xff] %vm223_vm0, %v967_v15  ;;  %627 = vst.msk [vmem:[%s949_s11 + $0x128] sm:$0xff] %vm223_vm0, %v970_v16  ;;  %v985_v19 = vld [vmem:[%s944_s8 + $0x98] sm:$0xff]  ;;  %v988_v20 = vld [vmem:[%s944_s8 + $0x20] sm:$0xff]  ;;  %862 = vmatprep.subr.bf16.mxu0 %v861_v17  ;;  %868 = vmatprep.subr.bf16.mxu1 %v861_v17 }
  0x14   : > { %612 = vst.msk [vmem:[%s949_s11 + $0x38] sm:$0xff] %vm223_vm0, %v982_v18  ;;  %628 = vst.msk [vmem:[%s949_s11 + $0x138] sm:$0xff] %vm223_vm0, %v985_v19  ;;  %v196_v21 = vld [vmem:[%s944_s8 + $0xa0] sm:$0xff]  ;;  %v181_v22 = vld [vmem:[%s944_s8 + $0x28] sm:$0xff] }
  0x15   : > { %613 = vst.msk [vmem:[%s949_s11 + $0x48] sm:$0xff] %vm223_vm0, %v988_v20  ;;  %v197_v23 = vld [vmem:[%s944_s8 + $0xa8] sm:$0xff]  ;;  %629 = vst.msk [vmem:[%s949_s11 + $0x148] sm:$0xff] %vm223_vm0, %v196_v21  ;;  %v182_v24 = vld [vmem:[%s944_s8 + $0x30] sm:$0xff]  ;;  %864 = vmatpush3.bf16.msra.mxu0 %v861_v17 }
  0x16   : > { %614 = vst.msk [vmem:[%s949_s11 + $0x58] sm:$0xff] %vm223_vm0, %v181_v22  ;;  %630 = vst.msk [vmem:[%s949_s11 + $0x158] sm:$0xff] %vm223_vm0, %v197_v23  ;;  %v198_v25 = vld [vmem:[%s944_s8 + $0xb0] sm:$0xff]  ;;  %v183_v26 = vld [vmem:[%s944_s8 + $0x38] sm:$0xff]  ;;  %872 = vmatpush3.bf16.msra.mxu1 %v861_v17 }
  0x17   : > { %615 = vst.msk [vmem:[%s949_s11 + $0x68] sm:$0xff] %vm223_vm0, %v182_v24  ;;  %631 = vst.msk [vmem:[%s949_s11 + $0x168] sm:$0xff] %vm223_vm0, %v198_v25  ;;  %v199_v27 = vld [vmem:[%s944_s8 + $0xb8] sm:$0xff]  ;;  %v184_v28 = vld [vmem:[%s944_s8 + $0x40] sm:$0xff] }
  0x18   : > { %616 = vst.msk [vmem:[%s949_s11 + $0x78] sm:$0xff] %vm223_vm0, %v183_v26  ;;  %v200_v29 = vld [vmem:[%s944_s8 + $0xc0] sm:$0xff]  ;;  %632 = vst.msk [vmem:[%s949_s11 + $0x178] sm:$0xff] %vm223_vm0, %v199_v27  ;;  %v185_v30 = vld [vmem:[%s944_s8 + $0x48] sm:$0xff]  ;;  %802 = vmatmul.mubr.msk.f32.vlgmr.msra.gmra.mrb[0].mxu0 %vm223_vm0, %v954_v13 }
  0x19   : > { %617 = vst.msk [vmem:[%s949_s11 + $0x88] sm:$0xff] %vm223_vm0, %v184_v28  ;;  %633 = vst.msk [vmem:[%s949_s11 + $0x188] sm:$0xff] %vm223_vm0, %v200_v29  ;;  %v201_v31 = vld [vmem:[%s944_s8 + $0xc8] sm:$0xff]  ;;  %v186_v32 = vld [vmem:[%s944_s8 + $0x50] sm:$0xff]  ;;  %826 = vmatmul.mubr.msk.f32.vlgmr.msra.gmra.mrb[0].mxu1 %vm223_vm0, %v964_v14  ;;  %804 = vmatprep.mubr.msk.f32.mxu0 %vm223_vm0, %v967_v15 }
  0x1a   : > { %618 = vst.msk [vmem:[%s949_s11 + $0x98] sm:$0xff] %vm223_vm0, %v185_v30  ;;  %634 = vst.msk [vmem:[%s949_s11 + $0x198] sm:$0xff] %vm223_vm0, %v201_v31  ;;  %v202_v33 = vld [vmem:[%s944_s8 + $0xd0] sm:$0xff]  ;;  %v187_v34 = vld [vmem:[%s944_s8 + $0x58] sm:$0xff]  ;;  %828 = vmatprep.mubr.msk.f32.mxu1 %vm223_vm0, %v970_v16 }
  0x1b   : > { %619 = vst.msk [vmem:[%s949_s11 + $0xa8] sm:$0xff] %vm223_vm0, %v186_v32  ;;  %v203_v35 = vld [vmem:[%s944_s8 + $0xd8] sm:$0xff]  ;;  %635 = vst.msk [vmem:[%s949_s11 + $0x1a8] sm:$0xff] %vm223_vm0, %v202_v33  ;;  %v188_v36 = vld [vmem:[%s944_s8 + $0x60] sm:$0xff] }
  0x1c   : > { %620 = vst.msk [vmem:[%s949_s11 + $0xb8] sm:$0xff] %vm223_vm0, %v187_v34  ;;  %636 = vst.msk [vmem:[%s949_s11 + $0x1b8] sm:$0xff] %vm223_vm0, %v203_v35  ;;  %v204_v37 = vld [vmem:[%s944_s8 + $0xe0] sm:$0xff]  ;;  %v189_v38 = vld [vmem:[%s944_s8 + $0x68] sm:$0xff]  ;;  %805 = vmatmul.mubr.msk.f32.gmra.mrb[2].mxu0 %vm223_vm0, %v982_v18 }
  0x1d   : > { %621 = vst.msk [vmem:[%s949_s11 + $0xc8] sm:$0xff] %vm223_vm0, %v188_v36  ;;  %637 = vst.msk [vmem:[%s949_s11 + $0x1c8] sm:$0xff] %vm223_vm0, %v204_v37  ;;  %v205_v39 = vld [vmem:[%s944_s8 + $0xe8] sm:$0xff]  ;;  %v190_v40 = vld [vmem:[%s944_s8 + $0x70] sm:$0xff]  ;;  %829 = vmatmul.mubr.msk.f32.gmra.mrb[2].mxu1 %vm223_vm0, %v985_v19  ;;  %807 = vmatprep.mubr.msk.f32.mxu0 %vm223_vm0, %v988_v20 }
  0x1e   : > { %622 = vst.msk [vmem:[%s949_s11 + $0xd8] sm:$0xff] %vm223_vm0, %v189_v38  ;;  %v206_v41 = vld [vmem:[%s944_s8 + $0xf0] sm:$0xff]  ;;  %638 = vst.msk [vmem:[%s949_s11 + $0x1d8] sm:$0xff] %vm223_vm0, %v205_v39  ;;  %v191_v42 = vld [vmem:[%s944_s8 + $0x78] sm:$0xff]  ;;  %831 = vmatprep.mubr.msk.f32.mxu1 %vm223_vm0, %v196_v21 }
  0x1f   : > { %623 = vst.msk [vmem:[%s949_s11 + $0xe8] sm:$0xff] %vm223_vm0, %v190_v40  ;;  %639 = vst.msk [vmem:[%s949_s11 + $0x1e8] sm:$0xff] %vm223_vm0, %v206_v41  ;;  %v207_v43 = vld [vmem:[%s944_s8 + $0xf8] sm:$0xff] }
  0x20   : > { %624 = vst.msk [vmem:[%s949_s11 + $0xf8] sm:$0xff] %vm223_vm0, %v191_v42  ;;  %640 = vst.msk [vmem:[%s949_s11 + $0x1f8] sm:$0xff] %vm223_vm0, %v207_v43  ;;  %808 = vmatmul.mubr.msk.f32.gmra.mrb[4].mxu0 %vm223_vm0, %v181_v22 }
  0x21   : > { %832 = vmatmul.mubr.msk.f32.gmra.mrb[4].mxu1 %vm223_vm0, %v197_v23  ;;  %810 = vmatprep.mubr.msk.f32.mxu0 %vm223_vm0, %v182_v24 }
  0x22   : > { %834 = vmatprep.mubr.msk.f32.mxu1 %vm223_vm0, %v198_v25 }
  0x24   : > { %811 = vmatmul.mubr.msk.f32.gmra.mrb[6].mxu0 %vm223_vm0, %v183_v26 }
  0x25   : > { %835 = vmatmul.mubr.msk.f32.gmra.mrb[6].mxu1 %vm223_vm0, %v199_v27  ;;  %813 = vmatprep.mubr.msk.f32.mxu0 %vm223_vm0, %v184_v28 }
  0x26   : > { %837 = vmatprep.mubr.msk.f32.mxu1 %vm223_vm0, %v200_v29 }
  0x28   : > { %814 = vmatmul.mubr.msk.f32.gmra.mrb[8].mxu0 %vm223_vm0, %v185_v30 }
  0x29   : > { %838 = vmatmul.mubr.msk.f32.gmra.mrb[8].mxu1 %vm223_vm0, %v201_v31  ;;  %816 = vmatprep.mubr.msk.f32.mxu0 %vm223_vm0, %v186_v32 }
  0x2a   : > { %840 = vmatprep.mubr.msk.f32.mxu1 %vm223_vm0, %v202_v33 }
  0x2c   : > { %817 = vmatmul.mubr.msk.f32.gmra.mrb[10].mxu0 %vm223_vm0, %v187_v34 }
  0x2d   : > { %841 = vmatmul.mubr.msk.f32.gmra.mrb[10].mxu1 %vm223_vm0, %v203_v35  ;;  %819 = vmatprep.mubr.msk.f32.mxu0 %vm223_vm0, %v188_v36 }
  0x2e   : > { %843 = vmatprep.mubr.msk.f32.mxu1 %vm223_vm0, %v204_v37 }
  0x30   : > { %820 = vmatmul.mubr.msk.f32.gmra.mrb[12].mxu0 %vm223_vm0, %v189_v38 }
  0x31   : > { %844 = vmatmul.mubr.msk.f32.gmra.mrb[12].mxu1 %vm223_vm0, %v205_v39  ;;  %822 = vmatprep.mubr.msk.f32.mxu0 %vm223_vm0, %v190_v40 }
  0x32   : > { %846 = vmatprep.mubr.msk.f32.mxu1 %vm223_vm0, %v206_v41 }
  0x34   : > { %823 = vmatmul.mubr.msk.f32.gmra.mrb[14].mxu0 %vm223_vm0, %v191_v42 }
  0x35   : > { %847 = vmatmul.mubr.msk.f32.gmra.mrb[14].mxu1 %vm223_vm0, %v207_v43 }
  0xeb   : > { %v803_v45 = vpop.f32.mrb[0].mxu0 }
  0xec   : > { %v827_v46 = vpop.f32.mrb[0].mxu1  ;;  %v392_v47 = vadd.f32 %v803_v45, %v1110_v44  ;;  %v386_v49 = vpop.f32.mrb[1].mxu0 }
  0xed   : > { %v472_v48 = vadd.f32 %v827_v46, %v1110_v44  ;;  %v466_v50 = vpop.f32.mrb[1].mxu1  ;;  %v387_v51 = vadd.f32 %v1110_v44, %v386_v49 }
  0xee   : > { %v467_v52 = vadd.f32 %v1110_v44, %v466_v50  ;;  %v546_v53 = vmax.f32 %v392_v47, 0.0 }
  0xef   : > { %v562_v54 = vmax.f32 %v472_v48, 0.0  ;;  %v545_v55 = vmax.f32 %v387_v51, 0.0  ;;  %v806_v57 = vpop.f32.mrb[2].mxu0 }
  0xf0   : > { %v561_v56 = vmax.f32 %v467_v52, 0.0  ;;  %v830_v58 = vpop.f32.mrb[2].mxu1  ;;  %578 = vst [vmem:[%s949_s11 + $0x10] sm:$0xff] %v546_v53  ;;  %v402_v59 = vadd.f32 %v806_v57, %v1110_v44  ;;  %v396_v61 = vpop.f32.mrb[3].mxu0 }
  0xf1   : > { %594 = vst [vmem:[%s949_s11 + $0x110] sm:$0xff] %v562_v54  ;;  %v482_v60 = vadd.f32 %v830_v58, %v1110_v44  ;;  %v476_v62 = vpop.f32.mrb[3].mxu1  ;;  %577 = vst [vmem:[%s949_s11] sm:$0xff] %v545_v55  ;;  %v397_v63 = vadd.f32 %v1110_v44, %v396_v61 }
  0xf2   : > { %593 = vst [vmem:[%s949_s11 + $0x100] sm:$0xff] %v561_v56  ;;  %v477_v0 = vadd.f32 %v1110_v44, %v476_v62  ;;  %v548_v1 = vmax.f32 %v402_v59, 0.0 }
  0xf3   : > { %v564_v2 = vmax.f32 %v482_v60, 0.0  ;;  %v547_v3 = vmax.f32 %v397_v63, 0.0  ;;  %v809_v5 = vpop.f32.mrb[4].mxu0 }
  0xf4   : > { %v563_v4 = vmax.f32 %v477_v0, 0.0  ;;  %v833_v6 = vpop.f32.mrb[4].mxu1  ;;  %580 = vst [vmem:[%s949_s11 + $0x30] sm:$0xff] %v548_v1  ;;  %v412_v7 = vadd.f32 %v809_v5, %v1110_v44  ;;  %v406_v9 = vpop.f32.mrb[5].mxu0 }
  0xf5   : > { %596 = vst [vmem:[%s949_s11 + $0x130] sm:$0xff] %v564_v2  ;;  %v492_v8 = vadd.f32 %v833_v6, %v1110_v44  ;;  %v486_v10 = vpop.f32.mrb[5].mxu1  ;;  %579 = vst [vmem:[%s949_s11 + $0x20] sm:$0xff] %v547_v3  ;;  %v407_v11 = vadd.f32 %v1110_v44, %v406_v9 }
  0xf6   : > { %595 = vst [vmem:[%s949_s11 + $0x120] sm:$0xff] %v563_v4  ;;  %v487_v12 = vadd.f32 %v1110_v44, %v486_v10  ;;  %v550_v13 = vmax.f32 %v412_v7, 0.0 }
  0xf7   : > { %v566_v14 = vmax.f32 %v492_v8, 0.0  ;;  %v549_v15 = vmax.f32 %v407_v11, 0.0  ;;  %v812_v17 = vpop.f32.mrb[6].mxu0 }
  0xf8   : > { %v565_v16 = vmax.f32 %v487_v12, 0.0  ;;  %v836_v18 = vpop.f32.mrb[6].mxu1  ;;  %582 = vst [vmem:[%s949_s11 + $0x50] sm:$0xff] %v550_v13  ;;  %v422_v19 = vadd.f32 %v812_v17, %v1110_v44  ;;  %v416_v21 = vpop.f32.mrb[7].mxu0 }
  0xf9   : > { %598 = vst [vmem:[%s949_s11 + $0x150] sm:$0xff] %v566_v14  ;;  %v502_v20 = vadd.f32 %v836_v18, %v1110_v44  ;;  %v496_v22 = vpop.f32.mrb[7].mxu1  ;;  %581 = vst [vmem:[%s949_s11 + $0x40] sm:$0xff] %v549_v15  ;;  %v417_v23 = vadd.f32 %v1110_v44, %v416_v21 }
  0xfa   : > { %597 = vst [vmem:[%s949_s11 + $0x140] sm:$0xff] %v565_v16  ;;  %v497_v24 = vadd.f32 %v1110_v44, %v496_v22  ;;  %v552_v25 = vmax.f32 %v422_v19, 0.0 }
  0xfb   : > { %v568_v26 = vmax.f32 %v502_v20, 0.0  ;;  %v551_v27 = vmax.f32 %v417_v23, 0.0  ;;  %v815_v29 = vpop.f32.mrb[8].mxu0 }
  0xfc   : > { %v567_v28 = vmax.f32 %v497_v24, 0.0  ;;  %v839_v30 = vpop.f32.mrb[8].mxu1  ;;  %584 = vst [vmem:[%s949_s11 + $0x70] sm:$0xff] %v552_v25  ;;  %v432_v31 = vadd.f32 %v815_v29, %v1110_v44  ;;  %v426_v33 = vpop.f32.mrb[9].mxu0 }
  0xfd   : > { %600 = vst [vmem:[%s949_s11 + $0x170] sm:$0xff] %v568_v26  ;;  %v512_v32 = vadd.f32 %v839_v30, %v1110_v44  ;;  %v506_v34 = vpop.f32.mrb[9].mxu1  ;;  %583 = vst [vmem:[%s949_s11 + $0x60] sm:$0xff] %v551_v27  ;;  %v427_v35 = vadd.f32 %v1110_v44, %v426_v33 }
  0xfe   : > { %599 = vst [vmem:[%s949_s11 + $0x160] sm:$0xff] %v567_v28  ;;  %v507_v36 = vadd.f32 %v1110_v44, %v506_v34  ;;  %v554_v37 = vmax.f32 %v432_v31, 0.0 }
  0xff   : > { %v570_v38 = vmax.f32 %v512_v32, 0.0  ;;  %v553_v39 = vmax.f32 %v427_v35, 0.0  ;;  %v818_v41 = vpop.f32.mrb[10].mxu0 }
 0x100   : > { %v569_v40 = vmax.f32 %v507_v36, 0.0  ;;  %v842_v42 = vpop.f32.mrb[10].mxu1  ;;  %586 = vst [vmem:[%s949_s11 + $0x90] sm:$0xff] %v554_v37  ;;  %v442_v43 = vadd.f32 %v818_v41, %v1110_v44  ;;  %v436_v46 = vpop.f32.mrb[11].mxu0 }
 0x101   : > { %602 = vst [vmem:[%s949_s11 + $0x190] sm:$0xff] %v570_v38  ;;  %v522_v45 = vadd.f32 %v842_v42, %v1110_v44  ;;  %v516_v47 = vpop.f32.mrb[11].mxu1  ;;  %585 = vst [vmem:[%s949_s11 + $0x80] sm:$0xff] %v553_v39  ;;  %v437_v48 = vadd.f32 %v1110_v44, %v436_v46 }
 0x102   : > { %601 = vst [vmem:[%s949_s11 + $0x180] sm:$0xff] %v569_v40  ;;  %v517_v49 = vadd.f32 %v1110_v44, %v516_v47  ;;  %v556_v50 = vmax.f32 %v442_v43, 0.0 }
 0x103   : > { %v572_v51 = vmax.f32 %v522_v45, 0.0  ;;  %v555_v52 = vmax.f32 %v437_v48, 0.0  ;;  %v821_v54 = vpop.f32.mrb[12].mxu0 }
 0x104   : > { %v571_v53 = vmax.f32 %v517_v49, 0.0  ;;  %v845_v55 = vpop.f32.mrb[12].mxu1  ;;  %588 = vst [vmem:[%s949_s11 + $0xb0] sm:$0xff] %v556_v50  ;;  %v452_v56 = vadd.f32 %v821_v54, %v1110_v44  ;;  %v446_v58 = vpop.f32.mrb[13].mxu0 }
 0x105   : > { %604 = vst [vmem:[%s949_s11 + $0x1b0] sm:$0xff] %v572_v51  ;;  %v532_v57 = vadd.f32 %v845_v55, %v1110_v44  ;;  %v526_v59 = vpop.f32.mrb[13].mxu1  ;;  %587 = vst [vmem:[%s949_s11 + $0xa0] sm:$0xff] %v555_v52  ;;  %v447_v60 = vadd.f32 %v1110_v44, %v446_v58 }
 0x106   : > { %603 = vst [vmem:[%s949_s11 + $0x1a0] sm:$0xff] %v571_v53  ;;  %v527_v61 = vadd.f32 %v1110_v44, %v526_v59  ;;  %v558_v62 = vmax.f32 %v452_v56, 0.0 }
 0x107   : > { %v574_v63 = vmax.f32 %v532_v57, 0.0  ;;  %v557_v0 = vmax.f32 %v447_v60, 0.0  ;;  %v824_v2 = vpop.f32.mrb[14].mxu0 }
 0x108   : > { %v573_v1 = vmax.f32 %v527_v61, 0.0  ;;  %v848_v3 = vpop.f32.mrb[14].mxu1  ;;  %590 = vst [vmem:[%s949_s11 + $0xd0] sm:$0xff] %v558_v62  ;;  %v462_v4 = vadd.f32 %v824_v2, %v1110_v44  ;;  %v456_v6 = vpop.f32.mrb[15].mxu0 }
 0x109   : > { %606 = vst [vmem:[%s949_s11 + $0x1d0] sm:$0xff] %v574_v63  ;;  %v542_v5 = vadd.f32 %v848_v3, %v1110_v44  ;;  %v536_v7 = vpop.f32.mrb[15].mxu1  ;;  %589 = vst [vmem:[%s949_s11 + $0xc0] sm:$0xff] %v557_v0  ;;  %v457_v8 = vadd.f32 %v1110_v44, %v456_v6 }
 0x10a   : > { %605 = vst [vmem:[%s949_s11 + $0x1c0] sm:$0xff] %v573_v1  ;;  %v537_v9 = vadd.f32 %v1110_v44, %v536_v7  ;;  %v560_v10 = vmax.f32 %v462_v4, 0.0 }
 0x10b   : > { %v576_v11 = vmax.f32 %v542_v5, 0.0  ;;  %v559_v12 = vmax.f32 %v457_v8, 0.0 }
 0x10c   : > { %v575_v13 = vmax.f32 %v537_v9, 0.0  ;;  %592 = vst [vmem:[%s949_s11 + $0xf0] sm:$0xff] %v560_v10 }
 0x10d   : > { %608 = vst [vmem:[%s949_s11 + $0x1f0] sm:$0xff] %v576_v11  ;;  %591 = vst [vmem:[%s949_s11 + $0xe0] sm:$0xff] %v559_v12 }
 0x10e   : > { %607 = vst [vmem:[%s949_s11 + $0x1e0] sm:$0xff] %v575_v13 }
 0x10f PF: > { %s13_s12 = sadd.s32 1, %s887_s12  }
 0x110   : > { %p10_p4 = scmp.ge.s32.totalorder %s13_s12, 4  }
 0x112   :  { %12 = sbr.rel (!%p10_p4) target bundleno = 1 (0x1), region = 62 }

</bundles_post_ra>
